<compile_context>
chip_gen: v7x
topology: tpu7x:2x2x1
jax: 0.10.0
libtpu: 0.0.40
codegen_flags: <defaults>
</compile_context>

<pallas_src>
import functools
import math

import jax
import jax.numpy as jnp
from jax import lax
from jax.experimental import pallas as pl
from jax.experimental.pallas import tpu as pltpu


# ----------------------------------------------------------------------------
# tile selection helper (always returns a legal block dim: aligned divisor,
# 8-aligned divisor, or the full dimension)
# ----------------------------------------------------------------------------
def _pick_tile(dim, target, align):
    if dim <= target:
        return dim
    t = (target // align) * align
    while t >= align:
        if dim % t == 0:
            return t
        t -= align
    if align > 8:
        t = (target // 8) * 8
        while t >= 8:
            if dim % t == 0:
                return t
            t -= 8
    # Last resort: full dimension (always a legal block shape).
    return dim


# ----------------------------------------------------------------------------
# Tiled linear (a @ W.T) kernels: bf16 operands, f32 accumulation
# ----------------------------------------------------------------------------
def _matmul_kernel_f32out(a_ref, w_ref, o_ref):
    # f32 output: accumulate directly into the (k-invariant) output block.
    @pl.when(pl.program_id(2) == 0)
    def _():
        o_ref[...] = jnp.zeros_like(o_ref)

    o_ref[...] += jnp.dot(a_ref[...], w_ref[...],
                          preferred_element_type=jnp.float32)


def _matmul_kernel_acc(a_ref, w_ref, o_ref, acc_ref):
    # Narrow (bf16) output: accumulate in f32 scratch, cast once at finalize.
    @pl.when(pl.program_id(2) == 0)
    def _():
        acc_ref[...] = jnp.zeros_like(acc_ref)

    acc_ref[...] += jnp.dot(a_ref[...], w_ref[...],
                            preferred_element_type=jnp.float32)

    @pl.when(pl.program_id(2) == pl.num_programs(2) - 1)
    def _():
        o_ref[...] = acc_ref[...].astype(o_ref.dtype)


def pallas_linear(a, w, out_dtype=jnp.float32):
    """a: (M, K); w: (N, K) in nn.Linear storage layout. Returns (M, N)."""
    M, K = a.shape
    N, K2 = w.shape
    assert K == K2
    a = a.astype(jnp.bfloat16)
    # One-time relayout of the weight to (K, N): plain NN matmul in-kernel,
    # amortized over every (M/tm) reuse of the weight stream.
    w_t = w.astype(jnp.bfloat16).T

    tm = _pick_tile(M, 512, 128)
    tn = _pick_tile(N, 256, 128)
    tk = _pick_tile(K, 512, 128)
    grid = (M // tm, N // tn, K // tk)

    out_bytes = jnp.dtype(out_dtype).itemsize
    cost = pl.CostEstimate(
        flops=2 * M * N * K,
        transcendentals=0,
        bytes_accessed=(M * K + N * K) * 2 + M * N * out_bytes)

    if out_dtype == jnp.float32:
        kernel = _matmul_kernel_f32out
        scratch = []
    else:
        kernel = _matmul_kernel_acc
        scratch = [pltpu.VMEM((tm, tn), jnp.float32)]

    return pl.pallas_call(
        kernel,
        out_shape=jax.ShapeDtypeStruct((M, N), out_dtype),
        grid_spec=pltpu.PrefetchScalarGridSpec(
            num_scalar_prefetch=0,
            grid=grid,
            in_specs=[
                pl.BlockSpec((tm, tk), lambda i, j, k: (i, k)),
                pl.BlockSpec((tk, tn), lambda i, j, k: (k, j)),
            ],
            out_specs=pl.BlockSpec((tm, tn), lambda i, j, k: (i, j)),
            scratch_shapes=scratch,
        ),
        compiler_params=pltpu.CompilerParams(
            dimension_semantics=("parallel", "parallel", "arbitrary"),
            vmem_limit_bytes=32 * 1024 * 1024),
        cost_estimate=cost,
    )(a, w_t)


# ----------------------------------------------------------------------------
# Flash-attention kernel: grid (B, H, q_tiles, kv_tiles), pre-split heads,
# bf16 MXU operands, masked KV tiles skipped via scalar-prefetched flags.
# ----------------------------------------------------------------------------
def _flash_attn_kernel(kv_any_ref, q_ref, k_ref, v_ref, bias_ref, o_ref,
                       m_sc, l_sc, acc_sc):
    ki = pl.program_id(3)

    @pl.when(ki == 0)
    def _():
        m_sc[...] = jnp.full_like(m_sc, -jnp.inf)
        l_sc[...] = jnp.zeros_like(l_sc)
        acc_sc[...] = jnp.zeros_like(acc_sc)

    # Skip KV tiles where every key is masked for this batch element.
    @pl.when(kv_any_ref[pl.program_id(0), ki] != 0)
    def _():
        q = q_ref[0, 0, 0]                       # (tq,  D) bf16, pre-scaled
        k = k_ref[0, 0, 0]                       # (tkv, D) bf16
        v = v_ref[0, 0, 0]                       # (tkv, D) bf16

        # scores: (tq, tkv) in f32 (bf16 operands on the MXU).
        s = lax.dot_general(q, k, (((1,), (1,)), ((), ())),
                            preferred_element_type=jnp.float32)
        s = s + bias_ref[0]                      # (1, tkv) additive mask bias

        m_prev = m_sc[...]                                       # (tq, 1)
        m_new = jnp.maximum(m_prev, s.max(-1, keepdims=True))
        alpha = jnp.exp(m_prev - m_new)
        p = jnp.exp(s - m_new)                                   # (tq, tkv) f32

        l_sc[...] = alpha * l_sc[...] + p.sum(-1, keepdims=True)
        acc_sc[...] = alpha * acc_sc[...] + jnp.dot(
            p.astype(jnp.bfloat16), v, preferred_element_type=jnp.float32)
        m_sc[...] = m_new

    @pl.when(ki == pl.num_programs(3) - 1)
    def _():
        inv_l = pl.reciprocal(l_sc[...], approx=True)            # EUP
        o_ref[0, 0] = (acc_sc[...] * inv_l).astype(o_ref.dtype)  # (tq, D) bf16


def pallas_flash_attention(qkvh, bias, mask):
    """qkvh: (3, B, H, L, D) bf16 (Q pre-scaled); bias: (B, 1, L) f32 additive;
    mask: (B, L) bool. Returns (B, H, L, D) bf16."""
    _, B, H, L, D = qkvh.shape
    tq = _pick_tile(L, 256, 128)
    tkv = _pick_tile(L, 256, 128)
    nq, nkv = L // tq, L // tkv
    grid = (B, H, nq, nkv)

    # Per-(batch, kv-tile) flag: 1 if the tile has at least one unmasked key.
    kv_any = (~jnp.all(mask.reshape(B, nkv, tkv), axis=-1)).astype(jnp.int32)

    q_spec = pl.BlockSpec((1, 1, 1, tq, D),
                          lambda b, h, qi, ki, kv: (0, b, h, qi, 0))
    k_spec = pl.BlockSpec((1, 1, 1, tkv, D),
                          lambda b, h, qi, ki, kv: (1, b, h, ki, 0))
    v_spec = pl.BlockSpec((1, 1, 1, tkv, D),
                          lambda b, h, qi, ki, kv: (2, b, h, ki, 0))
    bias_spec = pl.BlockSpec((1, 1, tkv),
                             lambda b, h, qi, ki, kv: (b, 0, ki))
    out_spec = pl.BlockSpec((1, 1, tq, D),
                            lambda b, h, qi, ki, kv: (b, h, qi, 0))

    cost = pl.CostEstimate(
        flops=4 * B * H * L * L * D,
        transcendentals=2 * B * H * L * L,
        bytes_accessed=4 * B * H * L * D * 2 + B * L * 4)

    return pl.pallas_call(
        _flash_attn_kernel,
        out_shape=jax.ShapeDtypeStruct((B, H, L, D), jnp.bfloat16),
        grid_spec=pltpu.PrefetchScalarGridSpec(
            num_scalar_prefetch=1,
            grid=grid,
            in_specs=[q_spec, k_spec, v_spec, bias_spec],
            out_specs=out_spec,
            scratch_shapes=[
                pltpu.VMEM((tq, 1), jnp.float32),   # running max
                pltpu.VMEM((tq, 1), jnp.float32),   # running denom
                pltpu.VMEM((tq, D), jnp.float32),   # output accumulator
            ],
        ),
        compiler_params=pltpu.CompilerParams(
            # 4 parallel-able axes (B, H, q) keep both v7x TensorCores busy.
            dimension_semantics=("parallel", "parallel", "parallel",
                                 "arbitrary"),
            vmem_limit_bytes=32 * 1024 * 1024),
        cost_estimate=cost,
    )(kv_any, qkvh, qkvh, qkvh, bias)


# ----------------------------------------------------------------------------
# Module wrapper (parameter init + forward)
# ----------------------------------------------------------------------------
def init_params(key, embed_dim):
    """Matches nn.init.xavier_uniform_ on the two Linear weights (bias=False)."""
    k1, k2 = jax.random.split(key)
    # proj.weight: (3E, E), xavier_uniform with gain=sqrt(2)
    bound = math.sqrt(2.0) * math.sqrt(6.0 / (embed_dim + 3 * embed_dim))
    w_proj = jax.random.uniform(k1, (3 * embed_dim, embed_dim),
                                jnp.float32, -bound, bound)
    # out_proj.weight: (E, E), xavier_uniform with gain=1
    bound2 = math.sqrt(6.0 / (2 * embed_dim))
    w_out = jax.random.uniform(k2, (embed_dim, embed_dim),
                               jnp.float32, -bound2, bound2)
    return w_proj, w_out


def multihead_attention(x, mask, w_proj, w_out, num_heads):
    """x: (L, B, E) f32, mask: (B, L) bool. Returns (L, B, E) f32."""
    L, B, E = x.shape
    H = num_heads
    assert E % H == 0
    D = E // H
    scaling = D ** (-0.5)

    # Fold the 1/sqrt(D) scaling into the Q rows of the projection weight
    # (no per-step VPU multiply inside the attention kernel).
    scale_vec = jnp.concatenate([jnp.full((E,), scaling, jnp.float32),
                                 jnp.ones((2 * E,), jnp.float32)])
    w_proj_eff = w_proj * scale_vec[:, None]

    # (L, B, E) -> (B, L, E): single layout pass, everything downstream stays
    # batch-major.
    xb = x.transpose(1, 0, 2)

    # Fused QKV projection emitted directly in bf16 (halves HBM traffic into
    # the attention kernel).
    qkv = pallas_linear(xb.reshape(B * L, E), w_proj_eff,
                        out_dtype=jnp.bfloat16)                 # (B*L, 3E) bf16

    # One relayout to pre-split heads: (B*L, 3E) -> (3, B, H, L, D).
    # The attention kernel then never transposes per grid step, and the fused
    # tensor is indexed (not split/copied) via the Q/K/V BlockSpecs.
    qkvh = qkv.reshape(B, L, 3, H, D).transpose(2, 0, 3, 1, 4)

    # Finite large-negative additive mask bias: no NaN for all-masked rows.
    bias = jnp.where(mask, -1e30, 0.0).astype(jnp.float32)[:, None, :]  # (B,1,L)

    # dropout=0.0 in the module default -> identity, omitted.
    attn = pallas_flash_attention(qkvh, bias, mask)             # (B, H, L, D) bf16

    # Merge heads (one cheap bf16 relayout), output projection in f32, then
    # back to the module's (L, B, E) layout.
    attn = attn.transpose(0, 2, 1, 3).reshape(B * L, E)
    out = pallas_linear(attn, w_out, out_dtype=jnp.float32)     # (B*L, E) f32
    return out.reshape(B, L, E).transpose(1, 0, 2)


# Pure-JAX / full-f32 reference (PyTorch semantics) for sanity checking.
def _reference(x, mask, w_proj, w_out, num_heads):
    L, B, E = x.shape
    H = num_heads
    D = E // H
    scaling = D ** (-0.5)
    qkv = x @ w_proj.T
    q, k, v = jnp.split(qkv, 3, axis=-1)
    q = q * scaling
    to_h = lambda t: t.reshape(L, B, H, D).transpose(1, 2, 0, 3)
    q, k, v = to_h(q), to_h(k), to_h(v)
    s = jnp.einsum("bhqd,bhkd->bhqk", q, k)
    s = jnp.where(mask[:, None, None, :], -jnp.inf, s)
    p = jax.nn.softmax(s, axis=-1)
    a = jnp.einsum("bhqk,bhkd->bhqd", p, v)
    a = a.transpose(2, 0, 1, 3).reshape(L, B, E)
    return a @ w_out.T


if __name__ == "__main__":
    LENGTH, BATCH, EMBED_DIM, NUM_HEADS = 8, 2, 32, 4

    key = jax.random.PRNGKey(0)
    kx, km, kp = jax.random.split(key, 3)

    x = jax.random.normal(kx, (LENGTH, BATCH, EMBED_DIM), jnp.float32)
    mask = jax.random.uniform(km, (BATCH, LENGTH)) < 0.3
    mask = mask.at[:, 0].set(False)  # ensure at least one unmasked key per row

    w_proj, w_out = init_params(kp, EMBED_DIM)

    out = multihead_attention(x, mask, w_proj, w_out, NUM_HEADS)
    out = jax.block_until_ready(out)

    ref = _reference(x, mask, w_proj, w_out, NUM_HEADS)
    assert out.shape == (LENGTH, BATCH, EMBED_DIM)
    # Projections and attention run with bf16 MXU operands / bf16 inter-kernel
    # tensors (f32 accumulation), so compare against the full-f32 reference
    # with a bf16-appropriate tolerance.
    assert jnp.allclose(out, ref, atol=5e-2, rtol=5e-2), (
        float(jnp.max(jnp.abs(out - ref))))

    print("KERNEL_OK")
</pallas_src>

<mosaic_0001>
module attributes {stable_mosaic.version = 11 : i64} {
  func.func @_matmul_kernel_acc(%arg0: i32, %arg1: i32, %arg2: i32, %arg3: memref<16x32xbf16, #tpu.memory_space<vmem>>, %arg4: memref<32x96xbf16, #tpu.memory_space<vmem>>, %arg5: memref<16x96xbf16, #tpu.memory_space<vmem>>, %arg6: memref<16x96xf32, #tpu.memory_space<vmem>>) attributes {dimension_semantics = [#tpu.dimension_semantics<parallel>, #tpu.dimension_semantics<parallel>, #tpu.dimension_semantics<arbitrary>], iteration_bounds = array<i64: 1, 1, 1>, scalar_prefetch = 0 : i64, scratch_operands = 1 : i64, tpu.core_type = #tpu.core_type<tc>, window_params = [{transform_indices = @transform_0, window_bounds = array<i64: 16, 32>}, {transform_indices = @transform_1, window_bounds = array<i64: 32, 96>}, {transform_indices = @transform_2, window_bounds = array<i64: 16, 96>}]} {
    %c0_i32 = arith.constant 0 : i32
    %0 = arith.cmpi eq, %arg2, %c0_i32 : i32
    %1 = arith.extui %0 : i1 to i32
    %c0_i32_0 = arith.constant 0 : i32
    %2 = arith.cmpi ne, %1, %c0_i32_0 : i32
    scf.if %2 {
      %cst_10 = arith.constant 0.000000e+00 : f32
      %12 = vector.broadcast %cst_10 : f32 to vector<16x96xf32>
      %c0_11 = arith.constant 0 : index
      %c0_12 = arith.constant 0 : index
      %13 = vector.load %arg6[%c0_11, %c0_12] : memref<16x96xf32, #tpu.memory_space<vmem>>, vector<16x96xf32>
      tpu.vector_store %arg6[%c0_11, %c0_12], %12 {strides = array<i32>} : memref<16x96xf32, #tpu.memory_space<vmem>>, vector<16x96xf32>,
    } else {
    }
    %c0 = arith.constant 0 : index
    %c0_1 = arith.constant 0 : index
    %3 = vector.load %arg6[%c0, %c0_1] : memref<16x96xf32, #tpu.memory_space<vmem>>, vector<16x96xf32>
    %c0_2 = arith.constant 0 : index
    %c0_3 = arith.constant 0 : index
    %4 = vector.load %arg3[%c0_2, %c0_3] : memref<16x32xbf16, #tpu.memory_space<vmem>>, vector<16x32xbf16>
    %c0_4 = arith.constant 0 : index
    %c0_5 = arith.constant 0 : index
    %5 = vector.load %arg4[%c0_4, %c0_5] : memref<32x96xbf16, #tpu.memory_space<vmem>>, vector<32x96xbf16>
    %cst = arith.constant dense<0.000000e+00> : vector<16x96xf32>
    %6 = tpu.matmul %4, %5, %cst {dimension_numbers = #tpu.dot_dimension_numbers<[1], [0], [0], [1], [0, 0, 1, 1], [], []>} : vector<16x32xbf16>, vector<32x96xbf16>, vector<16x96xf32> -> vector<16x96xf32>
    %7 = arith.addf %3, %6 : vector<16x96xf32>
    %c0_6 = arith.constant 0 : index
    %c0_7 = arith.constant 0 : index
    %8 = vector.load %arg6[%c0_6, %c0_7] : memref<16x96xf32, #tpu.memory_space<vmem>>, vector<16x96xf32>
    tpu.vector_store %arg6[%c0_6, %c0_7], %7 {strides = array<i32>} : memref<16x96xf32, #tpu.memory_space<vmem>>, vector<16x96xf32>,
    %c0_i32_8 = arith.constant 0 : i32
    %9 = arith.cmpi eq, %arg2, %c0_i32_8 : i32
    %10 = arith.extui %9 : i1 to i32
    %c0_i32_9 = arith.constant 0 : i32
    %11 = arith.cmpi ne, %10, %c0_i32_9 : i32
    scf.if %11 {
      %c0_10 = arith.constant 0 : index
      %c0_11 = arith.constant 0 : index
      %12 = vector.load %arg6[%c0_10, %c0_11] : memref<16x96xf32, #tpu.memory_space<vmem>>, vector<16x96xf32>
      %13 = arith.truncf %12 : vector<16x96xf32> to vector<16x96xbf16>
      %c0_12 = arith.constant 0 : index
      %c0_13 = arith.constant 0 : index
      %14 = vector.load %arg5[%c0_12, %c0_13] : memref<16x96xbf16, #tpu.memory_space<vmem>>, vector<16x96xbf16>
      tpu.vector_store %arg5[%c0_12, %c0_13], %13 {strides = array<i32>} : memref<16x96xbf16, #tpu.memory_space<vmem>>, vector<16x96xbf16>,
    } else {
    }
    return
  }
  func.func @transform_0(%arg0: i32, %arg1: i32, %arg2: i32) -> (i32, i32) {
    %c0_i32 = arith.constant 0 : i32
    return %arg0, %arg2 : i32, i32
  }
  func.func @transform_1(%arg0: i32, %arg1: i32, %arg2: i32) -> (i32, i32) {
    %c0_i32 = arith.constant 0 : i32
    return %arg2, %arg1 : i32, i32
  }
  func.func @transform_2(%arg0: i32, %arg1: i32, %arg2: i32) -> (i32, i32) {
    %c0_i32 = arith.constant 0 : i32
    return %arg0, %arg1 : i32, i32
  }
}

</mosaic_0001>

<bundles_post_ra>
// kernel: tpu_custom_call.1
= control target key start
LH: loop header
LB: loop body
LE: loop exit
PB: predicated region body
PF: predicated region fallthrough
CT: control target
= control target key end

     0   :  { %7 = vsyncpa [#allocation4], 0  ;;  %s329_s0 = inlined_call_operand.hbm [shape: bf16[16,32], index: 0, kind: input, shape index: {}]   ;;  %s330_s1 = inlined_call_operand.hbm [shape: bf16[32,96], index: 1, kind: input, shape index: {}]   ;;  %s331_s2 = inlined_call_operand.hbm [shape: bf16[16,96], index: 2, kind: output, shape index: {}]  }
   0x1   :  { %8 = vsyncpa [#allocation7], 0 }
   0x2   :  { %9 = vsyncpa [#allocation5], 0  ;;  %s258_s9 = smov [#allocation3]   ;;  %s186_s13 = scalar_lea.hbm %s329_s0, 128 }
   0x3   :  { %s15_s10 = sshll.u32 %s258_s9, 4  ;;  %p187_p0 = scmp.ne.s32.totalorder %s329_s0, %s186_s13  ;;  %s16_s10 = int_to_ptr.vmem [resolvable:$true] %s15_s10 }
   0x4   :  { %p190_p1 = scmp.lt.u32.totalorder %s186_s13, %s329_s0 }
   0x6   :  { %p192_p2 = pnand %p190_p1, %p187_p0 }
   0x8   :  { %195 = shalt.err (!%p192_p2)
}
   0x9   :  { %s196_s18 = scalar_lea.vmem %s16_s10, 128  ;;  %p201_p4 = scmp.lt.s32.totalorder %s16_s10, %s16_s10 }
   0xa   :  { %p197_p3 = scmp.ne.s32.totalorder %s16_s10, %s196_s18  ;;  %p202_p5 = scmp.lt.s32.totalorder %s196_s18, %s196_s18 }
   0xc   :  { %p203_p6 = por %p202_p5, %p201_p4 }
   0xe   :  { %p204_p7 = pnand %p203_p6, %p197_p3 }
  0x10   :  { %207 = shalt.err (!%p204_p7)
}
  0x11   :  { %s259_s19 = smov 64   ;;  %s260_s20 = smov 4  }
  0x12   :  { %21 = dma.hbm_to_vmem [thread:$0]  %s329_s0, 128, %s16_s10, [#allocation4], %s259_s19, %s259_s19, %s260_s20  }
  0x13   :  { %s261_s23 = smov [#allocation6]   ;;  %s208_s27 = scalar_lea.hbm %s330_s1, 256 }
  0x14   :  { %s27_s24 = sshll.u32 %s261_s23, 4  ;;  %p209_p8 = scmp.ne.s32.totalorder %s330_s1, %s208_s27  ;;  %s28_s24 = int_to_ptr.vmem [resolvable:$true] %s27_s24 }
  0x15   :  { %p212_p9 = scmp.lt.u32.totalorder %s208_s27, %s330_s1 }
  0x17   :  { %p214_p10 = pnand %p212_p9, %p209_p8 }
  0x19   :  { %217 = shalt.err (!%p214_p10)
}
  0x1a   :  { %s218_s4 = scalar_lea.vmem %s28_s24, 256  ;;  %p223_p12 = scmp.lt.s32.totalorder %s28_s24, %s28_s24 }
  0x1b   :  { %p219_p11 = scmp.ne.s32.totalorder %s28_s24, %s218_s4  ;;  %p224_p13 = scmp.lt.s32.totalorder %s218_s4, %s218_s4 }
  0x1d   :  { %p225_p0 = por %p224_p13, %p223_p12 }
  0x1f   :  { %p226_p1 = pnand %p225_p0, %p219_p11 }
  0x21   :  { %229 = shalt.err (!%p226_p1)
}
  0x22   :  { %33 = dma.hbm_to_vmem [thread:$0]  %s330_s1, 256, %s28_s24, [#allocation7], %s259_s19, %s259_s19, %s260_s20  }
  0x23   :  { %252 = dma.done.wait [#allocation4], 128  }
  0x24   :  { %253 = vsyncadd [#allocation4], 4294967168 }
  0x25   :  { %254 = dma.done.wait [#allocation7], 256  }
  0x26   :  { %255 = vsyncadd [#allocation7], 4294967040  ;;  %vm45_vm0 = vcmask 785408   ;;  %v262_v0 = vmov 0.0   ;;  %vm263_vm1 = vmmov 0   ;;  %v183_v1 = vld [vmem:[#allocation6] sm:$0xff]  }
  0x27   :  { %46 = vst.msk [vmem:[#allocation2] sm:$0xff] %vm45_vm0, %v262_v0  ;;  %47 = vst.msk [vmem:[#allocation2 + $0x8] sm:$0xff] %vm45_vm0, %v262_v0  ;;  %168 = vmatprep.subr.bf16.mxu0 %v262_v0  ;;  %172 = vmatprep.mubr.msk.bf16.mxu0 %vm263_vm1, %v262_v0  ;;  %v184_v2 = vld [vmem:[#allocation6 + $0x8] sm:$0xff]   ;;  %v185_v3 = vld [vmem:[#allocation3] sm:$0xff]   ;;  %vm73_vm2 = vcmask 261120   ;;  %vm136_vm3 = vcmask 781312  }
  0x28   :  { %169 = vmatpush3.bf16.msra.mxu0 %v183_v1  ;;  %s264_s1 = smov [#allocation8]  }
  0x29   :  { %170 = vmatprep.subr.bf16.mxu0 %v262_v0  ;;  %s144_s6 = sshll.u32 %s264_s1, 4  ;;  %s145_s6 = int_to_ptr.vmem [resolvable:$true] %s144_s6 }
  0x2a   :  { %s230_s7 = scalar_lea.vmem %s145_s6, 128  ;;  %p235_p3 = scmp.lt.s32.totalorder %s145_s6, %s145_s6 }
  0x2b   :  { %p231_p2 = scmp.ne.s32.totalorder %s145_s6, %s230_s7  ;;  %p236_p4 = scmp.lt.s32.totalorder %s230_s7, %s230_s7 }
  0x2c   :  { %171 = vmatpush3.bf16.msra.mxu0 %v184_v2 }
  0x2d   :  { %p237_p5 = por %p236_p4, %p235_p3 }
  0x2e   :  { %v48_v4 = vld [vmem:[#allocation2] sm:$0xff]  ;;  %v49_v6 = vld [vmem:[#allocation2 + $0x8] sm:$0xff] }
  0x2f   :  { %173 = vmatmul.mubr.msk.bf16.vlgmr.msra.gmra.mrb[0].mxu0 %vm73_vm2, %v185_v3  ;;  %p238_p6 = pnand %p237_p5, %p231_p2 }
 0x102   :  { %v111_v5 = vpop.f32.mrb[0].mxu0 }
 0x103   :  { %v118_v7 = vadd.f32 %v111_v5, %v48_v4  ;;  %v174_v8 = vpop.f32.mrb[1].mxu0 }
 0x104   :  { %v114_v9 = vpop.f32.mrb[2].mxu0 }
 0x105   :  { %121 = vst.msk [vmem:[#allocation2] sm:$0xff] %vm45_vm0, %v118_v7  ;;  %v119_v10 = vadd.f32 %v114_v9, %v49_v6  ;;  %v175_v11 = vpop.f32.mrb[3].mxu0 }
 0x107   :  { %122 = vst.msk [vmem:[#allocation2 + $0x8] sm:$0xff] %vm45_vm0, %v119_v10 }
 0x10c   :  { %v126_v12 = vld [vmem:[#allocation2] sm:$0xff] }
 0x10d   :  { %v163_v13 = vpack.c.bf16 %v126_v12, %v126_v12 }
 0x10e   :  { %v127_v14 = vld [vmem:[#allocation2 + $0x8] sm:$0xff] }
 0x10f   :  { %v164_v15 = vpack.c.bf16 %v127_v14, %v127_v14  ;;  %137 = vst.msk [vmem:[#allocation8] sm:$0xf] %vm136_vm3, %v163_v13 }
 0x111   :  { %138 = vst.msk [vmem:[#allocation8 + $0x4] sm:$0xf] %vm136_vm3, %v164_v15 }
 0x112   :  { %241 = shalt.err (!%p238_p6)
}
 0x113   :  { %s242_s10 = scalar_lea.hbm %s331_s2, 128 }
 0x114   :  { %p243_p7 = scmp.ne.s32.totalorder %s331_s2, %s242_s10  ;;  %p246_p8 = scmp.lt.u32.totalorder %s242_s10, %s331_s2 }
 0x116   :  { %p248_p9 = pnand %p246_p8, %p243_p7 }
 0x118   :  { %251 = shalt.err (!%p248_p9)
}
 0x119   :  { %150 = dma.vmem_to_hbm [thread:$0]  %s145_s6, 128, %s331_s2, [#allocation5], %s259_s19, %s259_s19, %s260_s20  }
 0x11a   :  { %256 = dma.done.wait [#allocation5], 128  }
 0x11b   :  { %257 = vsyncadd [#allocation5], 4294967168 }
 0x11c   :  { %154 = vsyncpa [#allocation4], 1 }
 0x11d   :  { %155 = vsyncpa [#allocation7], 1 }
 0x11e   :  { %156 = vsyncpa [#allocation5], 1 }

</bundles_post_ra>
